<compile_context>
chip_gen: v6e
topology: v6e:2x2x1
jax: 0.10.0
libtpu: 0.0.40
codegen_flags: <defaults>
</compile_context>

<pallas_src>
import functools

import jax
import jax.numpy as jnp
from jax.experimental import pallas as pl
from jax.experimental.pallas import tpu as pltpu

_MIB = 1024 * 1024


def _round_up(x, m):
    return ((x + m - 1) // m) * m


def _vmem_limit_bytes():
    """Per-generation scoped-VMEM limit (v7x: 64 MiB/TC physical, others 128 MiB)."""
    try:
        kind = jax.devices()[0].device_kind.lower()
    except Exception:
        return 48 * _MIB
    if "v2" in kind or "v3" in kind:
        return 12 * _MIB
    if "7" in kind:                      # v7x: 64 MiB per TensorCore
        return 48 * _MIB
    return 96 * _MIB                     # v4 / v5e / v5p / v6e: 128 MiB


def _seeding_loss_kernel(map_ref, seed_ref, lab_ref, out_ref,
                         msum_acc, cnt_acc, *, seed_thr, hw, group):
    k = pl.program_id(1)
    tm, tk = map_ref.shape
    n_groups = tk // group
    ragged = (hw % tk) != 0              # compile-time Python bool

    # Reset the per-row accumulators at the start of every spatial sweep.
    @pl.when(k == 0)
    def _():
        msum_acc[...] = jnp.zeros_like(msum_acc)
        cnt_acc[...] = jnp.zeros_like(cnt_acc)

    # Strip-mine over lane groups: intermediates stay (TM, GROUP)-sized, so
    # VMEM is dominated by the double-buffered input tiles only.
    for g in range(n_groups):
        sl = slice(g * group, (g + 1) * group)
        m = map_ref[:, sl].astype(jnp.float32)        # (TM, GROUP)
        s = seed_ref[:, sl]

        # Numerically stable logsigmoid(x) = min(x, 0) - log1p(exp(-|x|)).
        logsig = jnp.minimum(m, 0.0) - jnp.log1p(jnp.exp(-jnp.abs(m)))

        mask = s > seed_thr
        if ragged:
            # Mask lanes beyond the true spatial extent (no wrapper padding).
            col = (k * tk + g * group
                   + jax.lax.broadcasted_iota(jnp.int32, (tm, group), 1))
            mask = jnp.logical_and(mask, col < hw)

        msum_acc[...] += jnp.where(mask, logsig, 0.0)   # VPU adds only
        cnt_acc[...] += mask.astype(jnp.float32)

    # One cross-lane reduce + divide per row sweep, not per grid step.
    @pl.when(k == pl.num_programs(1) - 1)
    def _():
        row_sum = jnp.sum(msum_acc[...], axis=-1, keepdims=True)   # (TM, 1)
        row_cnt = jnp.sum(cnt_acc[...], axis=-1, keepdims=True)
        lab = lab_ref[...]                                         # (TM, 1)
        # Rows beyond N / unselected classes have lab == 0 -> term 0.
        # Selected class with zero seed pixels -> NaN (matches torch 0/0).
        out_ref[...] = jnp.where(lab > 0.0, row_sum / row_cnt,
                                 jnp.zeros_like(row_sum))


def seeding_loss(map_arr, map_seed, labels, seed_thr=0.3):
    B, C, H, W = map_arr.shape
    N = B * C
    HW = H * W

    # Flatten (free reshapes — no pad passes over the big arrays).
    m2 = map_arr.reshape(N, HW)
    s2 = map_seed.reshape(N, HW)
    m_isz = jnp.dtype(m2.dtype).itemsize
    s_isz = jnp.dtype(s2.dtype).itemsize

    # --- row tile: guarantee >=2 row blocks when possible (v7x megacore) ----
    if N >= 16:
        TM = min(_round_up(-(-N // 2), 8), 256)
    else:
        TM = _round_up(max(N, 1), 8)

    # --- lane tile: fill the per-generation VMEM budget ---------------------
    vmem_limit = _vmem_limit_bytes()
    headroom = 16 * _MIB                       # accumulators, temps, internal scratch
    data_budget = max(vmem_limit - headroom, 8 * _MIB)

    GROUP_MAX = 512                            # strip width inside the kernel
    MAX_GROUPS = 64                            # bound on in-kernel unroll

    tk_bytes_cap = data_budget // (2 * TM * (m_isz + s_isz))   # 2-deep buffering
    tk = min(_round_up(HW, 128),
             (tk_bytes_cap // 128) * 128,
             GROUP_MAX * MAX_GROUPS)
    tk = max(tk, 128)
    if tk >= GROUP_MAX:
        tk = (tk // GROUP_MAX) * GROUP_MAX
        group = GROUP_MAX
    else:
        group = tk

    grid_rows = -(-N // TM)
    grid_k = -(-HW // tk)
    Np = grid_rows * TM

    # Only the tiny labels column gets padded (rows beyond N -> 0 -> term 0).
    lab2 = (labels.reshape(N) != 0).astype(jnp.float32).reshape(N, 1)
    lab2 = jnp.pad(lab2, ((0, Np - N), (0, 0)))

    kernel = functools.partial(_seeding_loss_kernel,
                               seed_thr=float(seed_thr), hw=HW, group=group)

    terms = pl.pallas_call(
        kernel,
        out_shape=jax.ShapeDtypeStruct((Np, 1), jnp.float32),
        grid_spec=pltpu.PrefetchScalarGridSpec(
            num_scalar_prefetch=0,
            grid=(grid_rows, grid_k),
            in_specs=[
                pl.BlockSpec((TM, tk), lambda i, k: (i, k)),   # map
                pl.BlockSpec((TM, tk), lambda i, k: (i, k)),   # map_seed
                pl.BlockSpec((TM, 1), lambda i, k: (i, 0)),    # labels column
            ],
            out_specs=pl.BlockSpec((TM, 1), lambda i, k: (i, 0)),
            scratch_shapes=[
                pltpu.VMEM((TM, group), jnp.float32),   # masked logsigmoid partials
                pltpu.VMEM((TM, group), jnp.float32),   # mask-count partials
            ],
        ),
        compiler_params=pltpu.CompilerParams(
            dimension_semantics=("parallel", "arbitrary"),
            vmem_limit_bytes=int(vmem_limit)),
    )(m2, s2, lab2)

    # Tiny final reduction over B*C per-class terms (non-selected rows are 0).
    return -jnp.sum(terms) / jnp.float32(B)


def seeding_loss_ref(map_arr, map_seed, labels, seed_thr=0.3):
    """Pure-JAX reference mirroring the PyTorch forward."""
    B = map_arr.shape[0]
    logsig = jax.nn.log_sigmoid(map_arr.astype(jnp.float32))
    mask = map_seed > seed_thr
    msum = jnp.sum(jnp.where(mask, logsig, 0.0), axis=(2, 3))
    cnt = jnp.sum(mask, axis=(2, 3)).astype(jnp.float32)
    term = msum / cnt
    sel = labels != 0
    return -jnp.sum(jnp.where(sel, term, 0.0)) / B


def _run_case(key, B, C, H, W):
    k1, k2, k3 = jax.random.split(key, 3)
    map_arr = jax.random.normal(k1, (B, C, H, W), dtype=jnp.float32)
    map_seed = jax.random.uniform(k2, (B, C, H, W), dtype=jnp.float32)
    labels = (jax.random.uniform(k3, (B, C)) > 0.5).astype(jnp.float32)
    labels = labels.at[:, 0].set(1.0)      # at least one class per batch
    labels = labels.at[0, 1].set(0.0)      # keep some zeros

    out = jax.block_until_ready(seeding_loss(map_arr, map_seed, labels))
    ref = seeding_loss_ref(map_arr, map_seed, labels)
    assert jnp.allclose(out, ref, rtol=1e-5, atol=1e-5), (out, ref)


if __name__ == "__main__":
    key = jax.random.PRNGKey(0)
    ka, kb = jax.random.split(key)
    # Aligned shapes (B*C multiple of 8, H*W multiple of 128).
    _run_case(ka, B=2, C=4, H=16, W=16)
    # Ragged shapes: exercises the in-kernel row/column masking (no padding).
    _run_case(kb, B=2, C=5, H=13, W=13)
    print("KERNEL_OK")
</pallas_src>

<mosaic_0001>
module attributes {stable_mosaic.version = 11 : i64} {
  func.func @_seeding_loss_kernel(%arg0: i32, %arg1: i32, %arg2: memref<8x256xf32, #tpu.memory_space<vmem>>, %arg3: memref<8x256xf32, #tpu.memory_space<vmem>>, %arg4: memref<8x1xf32, #tpu.memory_space<vmem>>, %arg5: memref<8x1xf32, #tpu.memory_space<vmem>>, %arg6: memref<8x256xf32, #tpu.memory_space<vmem>>, %arg7: memref<8x256xf32, #tpu.memory_space<vmem>>) attributes {dimension_semantics = [#tpu.dimension_semantics<parallel>, #tpu.dimension_semantics<arbitrary>], iteration_bounds = array<i64: 1, 1>, scalar_prefetch = 0 : i64, scratch_operands = 2 : i64, tpu.core_type = #tpu.core_type<tc>, window_params = [{transform_indices = @transform_0, window_bounds = array<i64: 8, 256>}, {transform_indices = @transform_1, window_bounds = array<i64: 8, 256>}, {transform_indices = @transform_2, window_bounds = array<i64: 8, 1>}, {transform_indices = @transform_3, window_bounds = array<i64: 8, 1>}]} {
    %c0_i32 = arith.constant 0 : i32
    %0 = arith.cmpi eq, %arg1, %c0_i32 : i32
    %1 = arith.extui %0 : i1 to i32
    %c0_i32_0 = arith.constant 0 : i32
    %2 = arith.cmpi ne, %1, %c0_i32_0 : i32
    scf.if %2 {
      %cst_17 = arith.constant 0.000000e+00 : f32
      %28 = vector.broadcast %cst_17 : f32 to vector<8x256xf32>
      %c0_18 = arith.constant 0 : index
      %c0_19 = arith.constant 0 : index
      %29 = vector.load %arg6[%c0_18, %c0_19] : memref<8x256xf32, #tpu.memory_space<vmem>>, vector<8x256xf32>
      tpu.vector_store %arg6[%c0_18, %c0_19], %28 {strides = array<i32>} : memref<8x256xf32, #tpu.memory_space<vmem>>, vector<8x256xf32>,
      %cst_20 = arith.constant 0.000000e+00 : f32
      %30 = vector.broadcast %cst_20 : f32 to vector<8x256xf32>
      %c0_21 = arith.constant 0 : index
      %c0_22 = arith.constant 0 : index
      %31 = vector.load %arg7[%c0_21, %c0_22] : memref<8x256xf32, #tpu.memory_space<vmem>>, vector<8x256xf32>
      tpu.vector_store %arg7[%c0_21, %c0_22], %30 {strides = array<i32>} : memref<8x256xf32, #tpu.memory_space<vmem>>, vector<8x256xf32>,
    } else {
    }
    %c0 = arith.constant 0 : index
    %c0_1 = arith.constant 0 : index
    %3 = vector.load %arg2[%c0, %c0_1] : memref<8x256xf32, #tpu.memory_space<vmem>>, vector<8x256xf32>
    %c0_2 = arith.constant 0 : index
    %c0_3 = arith.constant 0 : index
    %4 = vector.load %arg3[%c0_2, %c0_3] : memref<8x256xf32, #tpu.memory_space<vmem>>, vector<8x256xf32>
    %cst = arith.constant 0.000000e+00 : f32
    %5 = vector.broadcast %cst : f32 to vector<8x256xf32>
    %6 = arith.minimumf %3, %5 : vector<8x256xf32>
    %7 = math.absf %3 : vector<8x256xf32>
    %cst_4 = arith.constant 0.000000e+00 : f32
    %8 = vector.broadcast %cst_4 : f32 to vector<8x256xf32>
    %9 = arith.subf %8, %7 : vector<8x256xf32>
    %10 = math.exp %9 : vector<8x256xf32>
    %11 = math.log1p %10 : vector<8x256xf32>
    %12 = arith.subf %6, %11 : vector<8x256xf32>
    %cst_5 = arith.constant 3.000000e-01 : f32
    %13 = vector.broadcast %cst_5 : f32 to vector<8x256xf32>
    %14 = arith.cmpf ogt, %4, %13 : vector<8x256xf32>
    %c0_6 = arith.constant 0 : index
    %c0_7 = arith.constant 0 : index
    %15 = vector.load %arg6[%c0_6, %c0_7] : memref<8x256xf32, #tpu.memory_space<vmem>>, vector<8x256xf32>
    %cst_8 = arith.constant 0.000000e+00 : f32
    %16 = vector.broadcast %cst_8 : f32 to vector<8x256xf32>
    %17 = arith.select %14, %12, %16 : vector<8x256xi1>, vector<8x256xf32>
    %18 = arith.addf %15, %17 : vector<8x256xf32>
    %c0_9 = arith.constant 0 : index
    %c0_10 = arith.constant 0 : index
    %19 = vector.load %arg6[%c0_9, %c0_10] : memref<8x256xf32, #tpu.memory_space<vmem>>, vector<8x256xf32>
    tpu.vector_store %arg6[%c0_9, %c0_10], %18 {strides = array<i32>} : memref<8x256xf32, #tpu.memory_space<vmem>>, vector<8x256xf32>,
    %c0_11 = arith.constant 0 : index
    %c0_12 = arith.constant 0 : index
    %20 = vector.load %arg7[%c0_11, %c0_12] : memref<8x256xf32, #tpu.memory_space<vmem>>, vector<8x256xf32>
    %21 = arith.extui %14 : vector<8x256xi1> to vector<8x256xi32>
    %22 = arith.sitofp %21 : vector<8x256xi32> to vector<8x256xf32>
    %23 = arith.addf %20, %22 : vector<8x256xf32>
    %c0_13 = arith.constant 0 : index
    %c0_14 = arith.constant 0 : index
    %24 = vector.load %arg7[%c0_13, %c0_14] : memref<8x256xf32, #tpu.memory_space<vmem>>, vector<8x256xf32>
    tpu.vector_store %arg7[%c0_13, %c0_14], %23 {strides = array<i32>} : memref<8x256xf32, #tpu.memory_space<vmem>>, vector<8x256xf32>,
    %c0_i32_15 = arith.constant 0 : i32
    %25 = arith.cmpi eq, %arg1, %c0_i32_15 : i32
    %26 = arith.extui %25 : i1 to i32
    %c0_i32_16 = arith.constant 0 : i32
    %27 = arith.cmpi ne, %26, %c0_i32_16 : i32
    scf.if %27 {
      %c0_17 = arith.constant 0 : index
      %c0_18 = arith.constant 0 : index
      %28 = vector.load %arg6[%c0_17, %c0_18] : memref<8x256xf32, #tpu.memory_space<vmem>>, vector<8x256xf32>
      %cst_19 = arith.constant dense<0.000000e+00> : vector<8xf32>
      %29 = vector.multi_reduction <add>, %28, %cst_19 [1] : vector<8x256xf32> to vector<8xf32>
      %30 = vector.shape_cast %29 : vector<8xf32> to vector<8x1xf32>
      %c0_20 = arith.constant 0 : index
      %c0_21 = arith.constant 0 : index
      %31 = vector.load %arg7[%c0_20, %c0_21] : memref<8x256xf32, #tpu.memory_space<vmem>>, vector<8x256xf32>
      %cst_22 = arith.constant dense<0.000000e+00> : vector<8xf32>
      %32 = vector.multi_reduction <add>, %31, %cst_22 [1] : vector<8x256xf32> to vector<8xf32>
      %33 = vector.shape_cast %32 : vector<8xf32> to vector<8x1xf32>
      %c0_23 = arith.constant 0 : index
      %c0_24 = arith.constant 0 : index
      %34 = vector.load %arg4[%c0_23, %c0_24] : memref<8x1xf32, #tpu.memory_space<vmem>>, vector<8x1xf32>
      %cst_25 = arith.constant 0.000000e+00 : f32
      %35 = vector.broadcast %cst_25 : f32 to vector<8x1xf32>
      %36 = arith.cmpf ogt, %34, %35 : vector<8x1xf32>
      %37 = arith.divf %30, %33 : vector<8x1xf32>
      %cst_26 = arith.constant 0.000000e+00 : f32
      %38 = vector.broadcast %cst_26 : f32 to vector<8x1xf32>
      %39 = arith.select %36, %37, %38 : vector<8x1xi1>, vector<8x1xf32>
      %c0_27 = arith.constant 0 : index
      %c0_28 = arith.constant 0 : index
      %40 = vector.load %arg5[%c0_27, %c0_28] : memref<8x1xf32, #tpu.memory_space<vmem>>, vector<8x1xf32>
      tpu.vector_store %arg5[%c0_27, %c0_28], %39 {strides = array<i32>} : memref<8x1xf32, #tpu.memory_space<vmem>>, vector<8x1xf32>,
    } else {
    }
    return
  }
  func.func @transform_0(%arg0: i32, %arg1: i32) -> (i32, i32) {
    %c0_i32 = arith.constant 0 : i32
    return %arg0, %arg1 : i32, i32
  }
  func.func @transform_1(%arg0: i32, %arg1: i32) -> (i32, i32) {
    %c0_i32 = arith.constant 0 : i32
    return %arg0, %arg1 : i32, i32
  }
  func.func @transform_2(%arg0: i32, %arg1: i32) -> (i32, i32) {
    %c0_i32 = arith.constant 0 : i32
    %c0_i32_0 = arith.constant 0 : i32
    return %arg0, %c0_i32 : i32, i32
  }
  func.func @transform_3(%arg0: i32, %arg1: i32) -> (i32, i32) {
    %c0_i32 = arith.constant 0 : i32
    %c0_i32_0 = arith.constant 0 : i32
    return %arg0, %c0_i32 : i32, i32
  }
}

</mosaic_0001>

<bundles_post_ra>
// kernel: tpu_custom_call.1
= control target key start
LH: loop header
LB: loop body
LE: loop exit
PB: predicated region body
PF: predicated region fallthrough
CT: control target
= control target key end

     0   :  { %8 = vsyncpa [#allocation5], 0  ;;  %s224_s0 = inlined_call_operand.hbm [shape: f32[8,256], index: 0, kind: input, shape index: {}]   ;;  %s225_s1 = inlined_call_operand.hbm [shape: f32[8,256], index: 1, kind: input, shape index: {}]   ;;  %s226_s2 = inlined_call_operand.vmem [shape: f32[8,1], index: 2, kind: input, shape index: {}]   ;;  %s227_s3 = inlined_call_operand.vmem [shape: f32[8,1], index: 3, kind: output, shape index: {}]  }
   0x1   :  { %9 = vsyncpa [#allocation7], 0  ;;  %s185_s12 = smov [#allocation4]   ;;  %s186_s14 = smov [#allocation6]  }
   0x2   :  { %s16_s13 = sshll.u32 %s185_s12, 4  ;;  %s26_s15 = sshll.u32 %s186_s14, 4  ;;  %s17_s13 = int_to_ptr.vmem [resolvable:$true] %s16_s13  ;;  %s27_s15 = int_to_ptr.vmem [resolvable:$true] %s26_s15 }
   0x3   :  { %s149_s16 = scalar_lea.vmem %s17_s13, 256  ;;  %p154_p1 = scmp.lt.s32.totalorder %s17_s13, %s17_s13 }
   0x4   :  { %p150_p0 = scmp.ne.s32.totalorder %s17_s13, %s149_s16  ;;  %p155_p2 = scmp.lt.s32.totalorder %s149_s16, %s149_s16 }
   0x6   :  { %p156_p3 = por %p155_p2, %p154_p1 }
   0x8   :  { %p157_p4 = pnand %p156_p3, %p150_p0 }
   0xa   :  { %160 = shalt.err (!%p157_p4)
}
   0xb   :  { %19 = dma.hbm_to_vmem [thread:$0]  %s224_s0, 256, %s17_s13, [#allocation5]  }
   0xc   :  { %s169_s19 = scalar_lea.vmem %s27_s15, 256  ;;  %p174_p6 = scmp.lt.s32.totalorder %s27_s15, %s27_s15 }
   0xd   :  { %p170_p5 = scmp.ne.s32.totalorder %s27_s15, %s169_s19  ;;  %p175_p7 = scmp.lt.s32.totalorder %s169_s19, %s169_s19 }
   0xf   :  { %p176_p8 = por %p175_p7, %p174_p6 }
  0x11   :  { %p177_p9 = pnand %p176_p8, %p170_p5 }
  0x13   :  { %180 = shalt.err (!%p177_p9)
}
  0x14   :  { %29 = dma.hbm_to_vmem [thread:$0]  %s225_s1, 256, %s27_s15, [#allocation7]  }
  0x15   :  { %181 = dma.done.wait [#allocation5], 256  }
  0x16   :  { %182 = vsyncadd [#allocation5], 4294967040 }
  0x17   :  { %183 = dma.done.wait [#allocation7], 256  }
  0x18   :  { %184 = vsyncadd [#allocation7], 4294967040  ;;  %v48_v0 = vld [vmem:[#allocation6] sm:$0xff]  ;;  %v49_v1 = vld [vmem:[#allocation6 + $0x8] sm:$0xff]  ;;  %v187_v4 = vmov 0.0   ;;  %vm118_vm5 = vcmask 7168  }
  0x19   :  { %v46_v2 = vld [vmem:[#allocation4] sm:$0xff]  ;;  %vm80_vm0 = vcmp.gt.f32.partialorder %v48_v0, 0.3  ;;  %vm81_vm1 = vcmp.gt.f32.partialorder %v49_v1, 0.3  ;;  %v47_v3 = vld [vmem:[#allocation4 + $0x8] sm:$0xff] }
  0x1a   :  { %v126_v5 = vsel %vm80_vm0, 1.0, %v187_v4  ;;  %v127_v6 = vsel %vm81_vm1, 1.0, %v187_v4  ;;  %v52_v7 = vand.u32 2147483647, %v46_v2  ;;  %v53_v9 = vand.u32 2147483647, %v47_v3 }
  0x1b   :  { %v110_v8 = vadd.f32 %v127_v6, %v126_v5  ;;  %v50_v26 = vmin.f32 %v46_v2, 0.0  ;;  %v51_v29 = vmin.f32 %v47_v3, 0.0  ;;  %v113_v40 = vld [vmem:[%s226_s2] sm:$0xff] }
  0x1c   :  { %v54_v10 = vsub.f32 0.0, %v52_v7  ;;  %v55_v11 = vsub.f32 0.0, %v53_v9  ;;  %vm114_vm4 = vcmp.gt.f32.partialorder %v113_v40, 0.0 }
  0x1d   :  { %111 = vadd.xlane.f32.xlu0 %v110_v8 }
  0x1e   :  { %v56_v12 = vmul.f32 1.442695, %v54_v10  ;;  %v58_v13 = vmul.f32 1.442695, %v55_v11 }
  0x20   :  { %131 = vpow2.f32 %v56_v12 }
  0x21   :  { %133 = vpow2.f32 %v58_v13 }
  0x2d   :  { %v132_v14 = vpop.eup %131 }
  0x2e   :  { %v134_v15 = vpop.eup %133  ;;  %v60_v16 = vadd.f32 1.0, %v132_v14  ;;  %v63_v18 = vmul.f32 -0.5, %v132_v14  ;;  %v66_v21 = vand.u32 2147483647, %v132_v14 }
  0x2f   :  { %v69_v17 = vadd.f32 1.0, %v134_v15  ;;  %v72_v19 = vmul.f32 -0.5, %v134_v15  ;;  %v75_v23 = vand.u32 2147483647, %v134_v15 }
  0x30   :  { %135 = vlog2.f32 %v60_v16  ;;  %v64_v20 = vadd.f32 1.0, %v63_v18  ;;  %vm67_vm2 = vcmp.lt.f32.partialorder %v66_v21, 0.0004427343 }
  0x31   :  { %137 = vlog2.f32 %v69_v17  ;;  %v73_v22 = vadd.f32 1.0, %v72_v19  ;;  %vm76_vm3 = vcmp.lt.f32.partialorder %v75_v23, 0.0004427343 }
  0x32   :  { %v65_v24 = vmul.f32 %v132_v14, %v64_v20 }
  0x33   :  { %v74_v27 = vmul.f32 %v134_v15, %v73_v22 }
  0x3d   :  { %v136_v25 = vpop.eup %135 }
  0x3e   :  { %v138_v28 = vpop.eup %137  ;;  %v62_v30 = vmul.f32 0.6931472, %v136_v25 }
  0x3f   :  { %v71_v31 = vmul.f32 0.6931472, %v138_v28 }
  0x40   :  { %v68_v32 = vsel %vm67_vm2, %v65_v24, %v62_v30 }
  0x41   :  { %v77_v33 = vsel %vm76_vm3, %v74_v27, %v71_v31  ;;  %v78_v34 = vsub.f32 %v50_v26, %v68_v32 }
  0x42   :  { %v79_v35 = vsub.f32 %v51_v29, %v77_v33 }
  0x43   :  { %v84_v36 = vsel %vm80_vm0, %v78_v34, 0.0 }
  0x44   :  { %v85_v37 = vsel %vm81_vm1, %v79_v35, 0.0 }
  0x45   :  { %v105_v38 = vadd.f32 %v85_v37, %v84_v36 }
  0x47   :  { %106 = vadd.xlane.f32.xlu0 %v105_v38 }
  0xa6   :  { %v112_v39 = vpop.xlane.xlu0 %111 }
  0xa7   :  { %139 = vrcp.f32 %v112_v39 }
  0xb4   :  { %v140_v41 = vpop.eup %139 }
  0xd0   :  { %v107_v42 = vpop.xlane.xlu0 %106 }
  0xd1   :  { %v116_v43 = vmul.f32 %v140_v41, %v107_v42 }
  0xd3   :  { %v117_v44 = vsel %vm114_vm4, %v116_v43, 0.0 }
  0xd4   :  { %119 = vst.msk [vmem:[%s227_s3] sm:$0xff] %vm118_vm5, %v117_v44 }
  0xd5   :  { %124 = vsyncpa [#allocation5], 1 }
  0xd6   :  { %125 = vsyncpa [#allocation7], 1 }

</bundles_post_ra>
